<compile_context>
chip_gen: v7x
topology: tpu7x:2x2x1
jax: 0.10.0
libtpu: 0.0.40
codegen_flags: <defaults>
</compile_context>

<pallas_src>
from functools import partial

import jax
import jax.numpy as jnp
from jax import lax
from jax.experimental import pallas as pl
from jax.experimental.pallas import tpu as pltpu


def _round_up(x, m):
    return (x + m - 1) // m * m


# ---------------------------------------------------------------------------
# Kernel 1: row-tiled GEMM fused with (folded-BN) bias add + optional ReLU.
# Used for the stride-2 convs (conv1 / conv2) after im2col.
# ---------------------------------------------------------------------------
def _gemm_bias_kernel(p_ref, w_ref, b_ref, o_ref, *, apply_relu):
    acc = jnp.dot(p_ref[...], w_ref[...], preferred_element_type=jnp.float32)
    y = acc + b_ref[...]                       # (TM, N) + (1, N), f32 VPU
    if apply_relu:
        y = jnp.maximum(y, 0.0)
    o_ref[...] = y.astype(o_ref.dtype)


def _conv_gemm_pallas(patches, w_flat, bias, *, apply_relu, out_dtype,
                      tm_target=1024):
    """patches: (R, K); w_flat: (K, N); bias: (N,) f32  ->  (R, N) out_dtype."""
    R, K = patches.shape
    N = w_flat.shape[1]

    # Balanced row tiles (multiple of 16 for bf16 sublane packing); no R / N
    # padding — exact-N stores (block N == full dim) and cdiv boundary masking
    # replace the old pad-then-slice double pass.
    n_tiles = max(1, pl.cdiv(R, tm_target))
    TM = min(_round_up(pl.cdiv(R, n_tiles), 16), _round_up(R, 16))
    grid = pl.cdiv(R, TM)

    return pl.pallas_call(
        partial(_gemm_bias_kernel, apply_relu=apply_relu),
        out_shape=jax.ShapeDtypeStruct((R, N), out_dtype),
        grid=(grid,),
        in_specs=[
            pl.BlockSpec((TM, K), lambda i: (i, 0)),   # row tile of patches
            pl.BlockSpec((K, N), lambda i: (0, 0)),    # weight (resident)
            pl.BlockSpec((1, N), lambda i: (0, 0)),    # bias   (resident)
        ],
        out_specs=pl.BlockSpec((TM, N), lambda i: (i, 0)),
        compiler_params=pltpu.CompilerParams(
            dimension_semantics=("parallel",)),
    )(patches, w_flat, bias.reshape(1, N))


# ---------------------------------------------------------------------------
# Kernel 2: direct 3x3 stride-1 conv (no im2col).  The padded activation for
# one batch element stays resident in VMEM; each grid step produces TH output
# rows by accumulating 9 shifted tap matmuls, fusing the conv bias.
# ---------------------------------------------------------------------------
def _conv3x3_s1_kernel(x_ref, w_ref, b_ref, o_ref, *, th, wq, cin, cout,
                       apply_relu):
    r0 = pl.program_id(1) * th
    xwin = x_ref[pl.ds(r0, th + 2), :, :]            # (TH+2, Wq+2, Cin)
    acc = jnp.zeros((th * wq, cout), jnp.float32)
    for ky in range(3):                               # static, unrolled
        for kx in range(3):
            xs = xwin[ky:ky + th, kx:kx + wq, :].reshape(th * wq, cin)
            acc = acc + jnp.dot(xs, w_ref[3 * ky + kx],
                                preferred_element_type=jnp.float32)
    y = acc + b_ref[...]
    if apply_relu:
        y = jnp.maximum(y, 0.0)
    o_ref[...] = y.reshape(th, wq, cout).astype(o_ref.dtype)


def _pick_row_tile(hq, wq, target_rows=2048):
    """Largest divisor TH of hq with TH*wq <= target_rows (keeps tiles even,
    avoids in-kernel OOB on the resident input)."""
    best = 1
    for th in range(1, hq + 1):
        if hq % th == 0 and th * wq <= target_rows:
            best = th
    return best


def _conv3x3_s1_pallas(x_nhwc, w_tap, bias, *, apply_relu, out_dtype):
    """3x3 conv, stride 1, pad 1.  x_nhwc: (B,H,W,Cin); w_tap: (9,Cin,Cout)."""
    B, Hq, Wq, Cin = x_nhwc.shape
    Cout = w_tap.shape[-1]
    xpad = jnp.pad(x_nhwc, ((0, 0), (1, 1), (1, 1), (0, 0)))
    TH = _pick_row_tile(Hq, Wq)

    return pl.pallas_call(
        partial(_conv3x3_s1_kernel, th=TH, wq=Wq, cin=Cin, cout=Cout,
                apply_relu=apply_relu),
        out_shape=jax.ShapeDtypeStruct((B, Hq, Wq, Cout), out_dtype),
        grid=(B, Hq // TH),
        in_specs=[
            # Full padded image, resident across the row-tile axis.
            pl.BlockSpec((None, Hq + 2, Wq + 2, Cin),
                         lambda b, i: (b, 0, 0, 0)),
            pl.BlockSpec((9, Cin, Cout), lambda b, i: (0, 0, 0)),
            pl.BlockSpec((1, Cout), lambda b, i: (0, 0)),
        ],
        out_specs=pl.BlockSpec((None, TH, Wq, Cout),
                               lambda b, i: (b, i, 0, 0)),
        compiler_params=pltpu.CompilerParams(
            dimension_semantics=("parallel", "parallel")),
    )(xpad, w_tap, bias.reshape(1, Cout))


# ---------------------------------------------------------------------------
# Glue: im2col for 3x3 conv, padding=1, arbitrary stride (NHWC)
# ---------------------------------------------------------------------------
def _im2col_3x3(x, stride):
    B, H, W, C = x.shape
    xp = jnp.pad(x, ((0, 0), (1, 1), (1, 1), (0, 0)))
    Ho = (H + 2 - 3) // stride + 1
    Wo = (W + 2 - 3) // stride + 1
    taps = []
    for ky in range(3):
        for kx in range(3):
            taps.append(
                xp[:, ky:ky + stride * (Ho - 1) + 1:stride,
                      kx:kx + stride * (Wo - 1) + 1:stride, :])
    p = jnp.stack(taps, axis=3)                      # (B, Ho, Wo, 9, C)
    return p.reshape(B * Ho * Wo, 9 * C), Ho, Wo     # tap-major, then Cin


def _conv3x3_im2col_block(x_nhwc, w_hwio, scale, bias, *, stride, apply_relu,
                          compute_dtype, out_dtype):
    """3x3 conv (pad=1) + folded-BN affine + optional ReLU via im2col+GEMM."""
    B = x_nhwc.shape[0]
    Cin = x_nhwc.shape[-1]
    Cout = w_hwio.shape[-1]
    patches, Ho, Wo = _im2col_3x3(x_nhwc.astype(compute_dtype), stride)
    w_flat = (w_hwio.reshape(9 * Cin, Cout)
              * scale[None, :]).astype(compute_dtype)
    out = _conv_gemm_pallas(patches, w_flat, bias.astype(jnp.float32),
                            apply_relu=apply_relu, out_dtype=out_dtype)
    return out.reshape(B, Ho, Wo, Cout)


# ---------------------------------------------------------------------------
# BasicLayer (stem path) parameters + forward
# ---------------------------------------------------------------------------
def make_basic_layer_params(key, token_dims=64, in_chans=3, dtype=jnp.float32):
    inter = token_dims // 2
    eps = 1e-5
    k1, k2, k3, k4 = jax.random.split(key, 4)

    def conv_w(k, cin, cout):
        fan_in = 9 * cin
        return (jax.random.normal(k, (3, 3, cin, cout), dtype)
                * (2.0 / fan_in) ** 0.5)

    params = {}
    # conv1: 3 -> inter, stride 2, no bias, BN (inference form) + ReLU
    params["w1"] = conv_w(k1, in_chans, inter)
    params["s1"] = jnp.full((inter,), 1.0 / (1.0 + eps) ** 0.5, dtype)
    params["b1"] = jnp.zeros((inter,), dtype)
    # conv2: inter -> token_dims, stride 2, no bias, BN + ReLU
    params["w2"] = conv_w(k2, inter, token_dims)
    params["s2"] = jnp.full((token_dims,), 1.0 / (1.0 + eps) ** 0.5, dtype)
    params["b2"] = jnp.zeros((token_dims,), dtype)
    # conv3: token_dims -> token_dims, stride 1, WITH bias, no BN / ReLU
    params["w3"] = conv_w(k3, token_dims, token_dims)
    params["s3"] = jnp.ones((token_dims,), dtype)
    params["b3"] = jax.random.normal(k4, (token_dims,), dtype) * 0.01
    return params


def basic_layer_forward(x_nchw, params, compute_dtype=jnp.bfloat16):
    # NCHW -> NHWC, bf16 compute (f32 MXU accumulation everywhere)
    x = jnp.transpose(x_nchw, (0, 2, 3, 1)).astype(compute_dtype)

    # conv1: 3 -> token_dims//2, stride 2, folded BN + ReLU   (im2col + GEMM)
    x = _conv3x3_im2col_block(x, params["w1"], params["s1"], params["b1"],
                              stride=2, apply_relu=True,
                              compute_dtype=compute_dtype,
                              out_dtype=compute_dtype)
    # conv2: -> token_dims, stride 2, folded BN + ReLU        (im2col + GEMM)
    x = _conv3x3_im2col_block(x, params["w2"], params["s2"], params["b2"],
                              stride=2, apply_relu=True,
                              compute_dtype=compute_dtype,
                              out_dtype=compute_dtype)
    # conv3: token_dims -> token_dims, stride 1, conv bias    (direct kernel)
    Cin = x.shape[-1]
    w3_tap = (params["w3"].reshape(9, Cin, -1)
              * params["s3"][None, None, :]).astype(compute_dtype)
    x = _conv3x3_s1_pallas(x, w3_tap, params["b3"].astype(jnp.float32),
                           apply_relu=False, out_dtype=jnp.float32)

    B, H, W, C = x.shape
    # PatchEmbedding: permute(0,2,3,1).reshape(b, h*w, c) == NHWC flatten
    return x.reshape(B, H * W, C)
    # NC (NormalCell) blocks would follow here; not provided in this script.


# ---------------------------------------------------------------------------
# Pure-JAX f32 reference (lax conv) for a correctness check
# ---------------------------------------------------------------------------
def _reference_forward(x_nchw, params):
    x = jnp.transpose(x_nchw, (0, 2, 3, 1))

    def conv(x, w, s, b, stride, relu):
        y = lax.conv_general_dilated(
            x, w, window_strides=(stride, stride),
            padding=((1, 1), (1, 1)),
            dimension_numbers=("NHWC", "HWIO", "NHWC"))
        y = y * s + b
        return jnp.maximum(y, 0.0) if relu else y

    x = conv(x, params["w1"], params["s1"], params["b1"], 2, True)
    x = conv(x, params["w2"], params["s2"], params["b2"], 2, True)
    x = conv(x, params["w3"], params["s3"], params["b3"], 1, False)
    B, H, W, C = x.shape
    return x.reshape(B, H * W, C)


if __name__ == "__main__":
    key = jax.random.PRNGKey(0)
    k_in, k_par = jax.random.split(key)

    B, C, H, W = 2, 3, 16, 16            # small image, in_chans=3 (conv1 spec)
    token_dims = 64
    x = jax.random.normal(k_in, (B, C, H, W), jnp.float32)   # NCHW like PyTorch
    params = make_basic_layer_params(k_par, token_dims=token_dims, in_chans=C)

    out = jax.block_until_ready(basic_layer_forward(x, params))
    assert out.shape == (B, (H // 4) * (W // 4), token_dims), out.shape

    ref = jax.block_until_ready(_reference_forward(x, params))
    # bf16 operands with f32 accumulation -> loose-ish tolerance vs f32 ref.
    assert jnp.allclose(out, ref, atol=5e-2, rtol=5e-2), float(
        jnp.max(jnp.abs(out - ref)))

    print("KERNEL_OK")
</pallas_src>

<mosaic_0001>
module attributes {stable_mosaic.version = 11 : i64} {
  func.func @_gemm_bias_kernel(%arg0: i32, %arg1: memref<128x27xbf16, #tpu.memory_space<vmem>>, %arg2: memref<27x32xbf16, #tpu.memory_space<vmem>>, %arg3: memref<1x32xf32, #tpu.memory_space<vmem>>, %arg4: memref<128x32xbf16, #tpu.memory_space<vmem>>) attributes {dimension_semantics = [#tpu.dimension_semantics<parallel>], iteration_bounds = array<i64: 1>, scalar_prefetch = 0 : i64, scratch_operands = 0 : i64, tpu.core_type = #tpu.core_type<tc>, window_params = [{transform_indices = @transform_0, window_bounds = array<i64: 128, 27>}, {pipeline_mode = #tpu.pipeline_mode<synchronous>, transform_indices = @transform_1, window_bounds = array<i64: 27, 32>}, {pipeline_mode = #tpu.pipeline_mode<synchronous>, transform_indices = @transform_2, window_bounds = array<i64: 1, 32>}, {transform_indices = @transform_3, window_bounds = array<i64: 128, 32>}]} {
    %c0 = arith.constant 0 : index
    %c0_0 = arith.constant 0 : index
    %0 = vector.load %arg1[%c0, %c0_0] : memref<128x27xbf16, #tpu.memory_space<vmem>>, vector<128x27xbf16>
    %c0_1 = arith.constant 0 : index
    %c0_2 = arith.constant 0 : index
    %1 = vector.load %arg2[%c0_1, %c0_2] : memref<27x32xbf16, #tpu.memory_space<vmem>>, vector<27x32xbf16>
    %cst = arith.constant dense<0.000000e+00> : vector<128x32xf32>
    %2 = tpu.matmul %0, %1, %cst {dimension_numbers = #tpu.dot_dimension_numbers<[1], [0], [0], [1], [0, 0, 1, 1], [], []>} : vector<128x27xbf16>, vector<27x32xbf16>, vector<128x32xf32> -> vector<128x32xf32>
    %c0_3 = arith.constant 0 : index
    %c0_4 = arith.constant 0 : index
    %3 = vector.load %arg3[%c0_3, %c0_4] : memref<1x32xf32, #tpu.memory_space<vmem>>, vector<1x32xf32>
    %4 = vector.broadcast %3 : vector<1x32xf32> to vector<128x32xf32>
    %5 = arith.addf %2, %4 : vector<128x32xf32>
    %cst_5 = arith.constant 0.000000e+00 : f32
    %6 = vector.broadcast %cst_5 : f32 to vector<128x32xf32>
    %7 = arith.maximumf %5, %6 : vector<128x32xf32>
    %8 = arith.truncf %7 : vector<128x32xf32> to vector<128x32xbf16>
    %c0_6 = arith.constant 0 : index
    %c0_7 = arith.constant 0 : index
    %9 = vector.load %arg4[%c0_6, %c0_7] : memref<128x32xbf16, #tpu.memory_space<vmem>>, vector<128x32xbf16>
    tpu.vector_store %arg4[%c0_6, %c0_7], %8 {strides = array<i32>} : memref<128x32xbf16, #tpu.memory_space<vmem>>, vector<128x32xbf16>,
    return
  }
  func.func @transform_0(%arg0: i32) -> (i32, i32) {
    %c0_i32 = arith.constant 0 : i32
    %c0_i32_0 = arith.constant 0 : i32
    return %arg0, %c0_i32 : i32, i32
  }
  func.func @transform_1(%arg0: i32) -> (i32, i32) {
    %c0_i32 = arith.constant 0 : i32
    %c0_i32_0 = arith.constant 0 : i32
    %c0_i32_1 = arith.constant 0 : i32
    return %c0_i32, %c0_i32_0 : i32, i32
  }
  func.func @transform_2(%arg0: i32) -> (i32, i32) {
    %c0_i32 = arith.constant 0 : i32
    %c0_i32_0 = arith.constant 0 : i32
    %c0_i32_1 = arith.constant 0 : i32
    return %c0_i32, %c0_i32_0 : i32, i32
  }
  func.func @transform_3(%arg0: i32) -> (i32, i32) {
    %c0_i32 = arith.constant 0 : i32
    %c0_i32_0 = arith.constant 0 : i32
    return %arg0, %c0_i32 : i32, i32
  }
}

</mosaic_0001>

<bundles_post_ra>
// kernel: tpu_custom_call.1
= control target key start
LH: loop header
LB: loop body
LE: loop exit
PB: predicated region body
PF: predicated region fallthrough
CT: control target
= control target key end

     0   :  { %vm118_vm0 = vcmask 1044480   ;;  %vm119_vm1 = vcmask 1045504   ;;  %vm93_vm2 = vcmask 220160   ;;  %v419_v1 = vmov 65535   ;;  %s545_s1 = inlined_call_operand.vmem [shape: bf16[27,32], index: 1, kind: input, shape index: {}]   ;;  %s546_s0 = inlined_call_operand.vmem [shape: bf16[128,27], index: 0, kind: input, shape index: {}]   ;;  %s547_s2 = inlined_call_operand.vmem [shape: f32[1,32], index: 2, kind: input, shape index: {}]   ;;  %s548_s3 = inlined_call_operand.vmem [shape: bf16[128,32], index: 3, kind: output, shape index: {}]  }
   0x1   :  { %v409_v0 = vld [vmem:[%s545_s1] sm:$0xff]   ;;  %v120_v2 = vsel %vm118_vm0, 4294967295, %v419_v1  ;;  %v410_v3 = vld [vmem:[%s545_s1 + $0x8] sm:$0x3f]   ;;  %v415_v10 = vld [vmem:[%s546_s0 + $0x10] sm:$0xff]   ;;  %vm302_vm3 = vcmask 257024  }
   0x2   :  { %384 = vmatprep.subr.bf16.mxu0 %v409_v0  ;;  %404 = vmatprep.subr.bf16.mxu1 %v409_v0  ;;  %v121_v4 = vsel %vm119_vm1, %v120_v2, 0  ;;  %v411_v5 = vld [vmem:[%s546_s0] sm:$0xff]   ;;  %v413_v8 = vld [vmem:[%s546_s0 + $0x8] sm:$0xff]   ;;  %v416_v11 = vld [vmem:[%s546_s0 + $0x30] sm:$0xff]  }
   0x3   :  { %385 = vmatpush3.bf16.msra.mxu0 %v409_v0  ;;  %406 = vmatpush3.bf16.msra.mxu1 %v409_v0  ;;  %v123_v6 = vand.u32 %v410_v3, %v121_v4  ;;  %v412_v7 = vld [vmem:[%s546_s0 + $0x20] sm:$0xff]   ;;  %v414_v9 = vld [vmem:[%s546_s0 + $0x28] sm:$0xff]   ;;  %v417_v12 = vld [vmem:[%s546_s0 + $0x18] sm:$0xff]  }
   0x4   :  { %388 = vmatprep.mubr.msk.bf16.mxu0 %vm93_vm2, %v411_v5  ;;  %396 = vmatprep.mubr.msk.bf16.mxu1 %vm93_vm2, %v412_v7  ;;  %v418_v13 = vld [vmem:[%s546_s0 + $0x38] sm:$0xff]   ;;  %v323_v14 = vld [vmem:[%s547_s2] ss:$0 sm:$0xff] }
   0x5   :  { %386 = vmatprep.subr.bf16.mxu0 %v123_v6  ;;  %405 = vmatprep.subr.bf16.mxu1 %v123_v6 }
   0x7   :  { %387 = vmatpush3.bf16.msra.mxu0 %v123_v6  ;;  %407 = vmatpush3.bf16.msra.mxu1 %v123_v6 }
   0xa   :  { %389 = vmatmul.mubr.msk.bf16.vlgmr.msra.gmra.mrb[0].mxu0 %vm93_vm2, %v413_v8  ;;  %397 = vmatmul.mubr.msk.bf16.vlgmr.msra.gmra.mrb[0].mxu1 %vm93_vm2, %v414_v9 }
   0xb   :  { %392 = vmatprep.mubr.msk.bf16.mxu0 %vm93_vm2, %v415_v10  ;;  %400 = vmatprep.mubr.msk.bf16.mxu1 %vm93_vm2, %v416_v11 }
  0x12   :  { %393 = vmatmul.mubr.msk.bf16.gmra.mrb[4].mxu0 %vm93_vm2, %v417_v12  ;;  %401 = vmatmul.mubr.msk.bf16.gmra.mrb[4].mxu1 %vm93_vm2, %v418_v13 }
  0xdd   :  { %v390_v15 = vpop.f32.mrb[0].mxu0  ;;  %v398_v16 = vpop.f32.mrb[0].mxu1 }
  0xde   :  { %v168_v17 = vadd.f32 %v390_v15, %v323_v14  ;;  %v200_v18 = vadd.f32 %v398_v16, %v323_v14  ;;  %v159_v19 = vpop.f32.mrb[1].mxu0  ;;  %v191_v20 = vpop.f32.mrb[1].mxu1 }
  0xdf   :  { %v160_v21 = vadd.f32 %v323_v14, %v159_v19  ;;  %v192_v22 = vadd.f32 %v323_v14, %v191_v20  ;;  %v391_v23 = vpop.f32.mrb[2].mxu0  ;;  %v399_v24 = vpop.f32.mrb[2].mxu1 }
  0xe0   :  { %v224_v25 = vmax.f32 %v168_v17, 0.0  ;;  %v232_v26 = vmax.f32 %v200_v18, 0.0  ;;  %v171_v27 = vadd.f32 %v391_v23, %v323_v14  ;;  %v203_v28 = vadd.f32 %v399_v24, %v323_v14  ;;  %v162_v29 = vpop.f32.mrb[3].mxu0  ;;  %v194_v30 = vpop.f32.mrb[3].mxu1 }
  0xe1   :  { %v222_v31 = vmax.f32 %v160_v21, 0.0  ;;  %v230_v32 = vmax.f32 %v192_v22, 0.0  ;;  %v163_v33 = vadd.f32 %v323_v14, %v162_v29  ;;  %v195_v34 = vadd.f32 %v323_v14, %v194_v30 }
  0xe2   :  { %v360_v35 = vpack.c.bf16 %v224_v25, %v224_v25  ;;  %v368_v36 = vpack.c.bf16 %v232_v26, %v232_v26  ;;  %v225_v37 = vmax.f32 %v171_v27, 0.0  ;;  %v233_v38 = vmax.f32 %v203_v28, 0.0 }
  0xe3   :  { %v358_v39 = vpack.c.bf16 %v222_v31, %v222_v31  ;;  %v366_v40 = vpack.c.bf16 %v230_v32, %v230_v32  ;;  %v223_v41 = vmax.f32 %v163_v33, 0.0  ;;  %v231_v42 = vmax.f32 %v195_v34, 0.0 }
  0xe4   :  { %305 = vst.msk [vmem:[%s548_s3 + $0x8] sm:$0xf] %vm302_vm3, %v360_v35  ;;  %313 = vst.msk [vmem:[%s548_s3 + $0x28] sm:$0xf] %vm302_vm3, %v368_v36  ;;  %v361_v43 = vpack.c.bf16 %v225_v37, %v225_v37  ;;  %v369_v44 = vpack.c.bf16 %v233_v38, %v233_v38 }
  0xe5   :  { %303 = vst.msk [vmem:[%s548_s3] sm:$0xf] %vm302_vm3, %v358_v39  ;;  %311 = vst.msk [vmem:[%s548_s3 + $0x20] sm:$0xf] %vm302_vm3, %v366_v40  ;;  %v359_v45 = vpack.c.bf16 %v223_v41, %v223_v41  ;;  %v367_v46 = vpack.c.bf16 %v231_v42, %v231_v42  ;;  %v394_v47 = vpop.f32.mrb[4].mxu0  ;;  %v402_v48 = vpop.f32.mrb[4].mxu1 }
  0xe6   :  { %306 = vst.msk [vmem:[%s548_s3 + $0xc] sm:$0xf] %vm302_vm3, %v361_v43  ;;  %314 = vst.msk [vmem:[%s548_s3 + $0x2c] sm:$0xf] %vm302_vm3, %v369_v44  ;;  %v184_v49 = vadd.f32 %v394_v47, %v323_v14  ;;  %v216_v50 = vadd.f32 %v402_v48, %v323_v14  ;;  %v175_v51 = vpop.f32.mrb[5].mxu0  ;;  %v207_v52 = vpop.f32.mrb[5].mxu1 }
  0xe7   :  { %304 = vst.msk [vmem:[%s548_s3 + $0x4] sm:$0xf] %vm302_vm3, %v359_v45  ;;  %312 = vst.msk [vmem:[%s548_s3 + $0x24] sm:$0xf] %vm302_vm3, %v367_v46  ;;  %v176_v53 = vadd.f32 %v323_v14, %v175_v51  ;;  %v208_v54 = vadd.f32 %v323_v14, %v207_v52  ;;  %v395_v55 = vpop.f32.mrb[6].mxu0  ;;  %v403_v56 = vpop.f32.mrb[6].mxu1 }
  0xe8   :  { %v228_v57 = vmax.f32 %v184_v49, 0.0  ;;  %v236_v58 = vmax.f32 %v216_v50, 0.0  ;;  %v187_v59 = vadd.f32 %v395_v55, %v323_v14  ;;  %v219_v60 = vadd.f32 %v403_v56, %v323_v14  ;;  %v178_v61 = vpop.f32.mrb[7].mxu0  ;;  %v210_v62 = vpop.f32.mrb[7].mxu1 }
  0xe9   :  { %v226_v63 = vmax.f32 %v176_v53, 0.0  ;;  %v234_v0 = vmax.f32 %v208_v54, 0.0  ;;  %v179_v1 = vadd.f32 %v323_v14, %v178_v61  ;;  %v211_v2 = vadd.f32 %v323_v14, %v210_v62 }
  0xea   :  { %v364_v3 = vpack.c.bf16 %v228_v57, %v228_v57  ;;  %v372_v4 = vpack.c.bf16 %v236_v58, %v236_v58  ;;  %v229_v5 = vmax.f32 %v187_v59, 0.0  ;;  %v237_v6 = vmax.f32 %v219_v60, 0.0 }
  0xeb   :  { %v362_v7 = vpack.c.bf16 %v226_v63, %v226_v63  ;;  %v370_v8 = vpack.c.bf16 %v234_v0, %v234_v0  ;;  %v227_v9 = vmax.f32 %v179_v1, 0.0  ;;  %v235_v10 = vmax.f32 %v211_v2, 0.0 }
  0xec   :  { %309 = vst.msk [vmem:[%s548_s3 + $0x18] sm:$0xf] %vm302_vm3, %v364_v3  ;;  %317 = vst.msk [vmem:[%s548_s3 + $0x38] sm:$0xf] %vm302_vm3, %v372_v4  ;;  %v365_v11 = vpack.c.bf16 %v229_v5, %v229_v5  ;;  %v373_v12 = vpack.c.bf16 %v237_v6, %v237_v6 }
  0xed   :  { %307 = vst.msk [vmem:[%s548_s3 + $0x10] sm:$0xf] %vm302_vm3, %v362_v7  ;;  %315 = vst.msk [vmem:[%s548_s3 + $0x30] sm:$0xf] %vm302_vm3, %v370_v8  ;;  %v363_v13 = vpack.c.bf16 %v227_v9, %v227_v9  ;;  %v371_v14 = vpack.c.bf16 %v235_v10, %v235_v10 }
  0xee   :  { %310 = vst.msk [vmem:[%s548_s3 + $0x1c] sm:$0xf] %vm302_vm3, %v365_v11  ;;  %318 = vst.msk [vmem:[%s548_s3 + $0x3c] sm:$0xf] %vm302_vm3, %v373_v12 }
  0xef   :  { %308 = vst.msk [vmem:[%s548_s3 + $0x14] sm:$0xf] %vm302_vm3, %v363_v13  ;;  %316 = vst.msk [vmem:[%s548_s3 + $0x34] sm:$0xf] %vm302_vm3, %v371_v14 }

</bundles_post_ra>
